<compile_context>
chip_gen: v7x
topology: tpu7x:2x2x1
jax: 0.10.0
libtpu: 0.0.40
codegen_flags: <defaults>
</compile_context>

<pallas_src>
import jax
import jax.numpy as jnp
from jax.experimental import pallas as pl
from jax.experimental.pallas import tpu as pltpu

_LANE = 128
_SUBLANE = 8
_NEG_INF = -1e30  # finite "-inf": padded logits -> exp() == 0, never NaN


def _round_up(n, m):
    return ((n + m - 1) // m) * m


def _gatenet_softmax_kernel(x_ref, w_ref, b_ref, o_ref):
    # x_ref: (TB, F) compute dtype; w_ref: (F, Mp) compute dtype;
    # b_ref: (1, Mp) f32 (pad columns = -1e30); o_ref: (TB, Mp) f32.
    logits = jnp.dot(x_ref[...], w_ref[...],
                     preferred_element_type=jnp.float32) + b_ref[...]
    m = jnp.max(logits, axis=1, keepdims=True)
    e = jnp.exp(logits - m)                    # pad columns contribute 0
    denom = jnp.sum(e, axis=1, keepdims=True)
    o_ref[...] = (e * pl.reciprocal(denom, approx=True)).astype(o_ref.dtype)


def _gatenet_logits_kernel(x_ref, w_ref, b_ref, o_ref):
    o_ref[...] = (jnp.dot(x_ref[...], w_ref[...],
                          preferred_element_type=jnp.float32)
                  + b_ref[...]).astype(o_ref.dtype)


def gate_net(x, w, b, *, softmax=True, compute_dtype=jnp.bfloat16,
             block_b=512):
    """GateNet forward.

    x: (..., v_dim*model_nums) float  (flattened to (B, F) like x.view(-1, F))
    w: (model_nums, F) float          (PyTorch nn.Linear weight, (out, in))
    b: (model_nums,) float
    Returns (B, model_nums) float32.
    """
    M, F = w.shape
    x2 = x.reshape(-1, F)
    B = x2.shape[0]

    # ---- lane-dense output: pad model_nums up to a full 128-lane vreg.
    Mp = _round_up(max(M, _LANE), _LANE)
    w_t = jnp.zeros((F, Mp), jnp.float32).at[:, :M].set(w.T.astype(jnp.float32))
    pad_val = _NEG_INF if softmax else 0.0
    b_p = jnp.full((1, Mp), pad_val, jnp.float32).at[0, :M].set(
        b.astype(jnp.float32))

    # ---- tile the batch; pad rows so TB divides Bp (extra rows sliced off).
    TB = min(_round_up(block_b, _SUBLANE), _round_up(B, _SUBLANE))
    Bp = _round_up(B, TB)
    x_p = jnp.zeros((Bp, F), jnp.float32).at[:B].set(x2.astype(jnp.float32))

    # ---- bf16 inputs (f32 MXU accumulation) -> half the HBM read traffic.
    x_c = x_p.astype(compute_dtype)
    w_c = w_t.astype(compute_dtype)

    grid = (Bp // TB,)
    kern = _gatenet_softmax_kernel if softmax else _gatenet_logits_kernel

    cost = pl.CostEstimate(
        flops=2 * Bp * F * Mp,
        transcendentals=Bp * Mp if softmax else 0,
        bytes_accessed=(x_c.size * x_c.dtype.itemsize
                        + w_c.size * w_c.dtype.itemsize
                        + b_p.size * 4 + Bp * Mp * 4),
    )

    out = pl.pallas_call(
        kern,
        out_shape=jax.ShapeDtypeStruct((Bp, Mp), jnp.float32),
        grid_spec=pltpu.PrefetchScalarGridSpec(
            num_scalar_prefetch=0,
            grid=grid,
            in_specs=[
                pl.BlockSpec((TB, F), lambda i: (i, 0)),   # batch-tiled x
                pl.BlockSpec((F, Mp), lambda i: (0, 0)),   # VMEM-resident W
                pl.BlockSpec((1, Mp), lambda i: (0, 0)),   # VMEM-resident bias
            ],
            out_specs=pl.BlockSpec((TB, Mp), lambda i: (i, 0)),
        ),
        compiler_params=pltpu.CompilerParams(
            dimension_semantics=("parallel",),   # batch axis: no reduction
            vmem_limit_bytes=32 * 1024 * 1024,
        ),
        cost_estimate=cost,
    )(x_c, w_c, b_p)

    return out[:B, :M]


def reference(x, w, b, *, softmax=True, compute_dtype=jnp.bfloat16):
    M, F = w.shape
    x2 = x.reshape(-1, F)
    logits = jnp.dot(x2.astype(compute_dtype), w.T.astype(compute_dtype),
                     preferred_element_type=jnp.float32) + b.astype(jnp.float32)
    if softmax:
        return jax.nn.softmax(logits, axis=1)
    return logits


if __name__ == "__main__":
    # GateNet(model_nums=4, v_dim=32, sm=1)
    model_nums, v_dim = 4, 32
    F = v_dim * model_nums     # 128 input features
    B = 16                     # batch

    key = jax.random.PRNGKey(0)
    kx, kw, kb = jax.random.split(key, 3)

    # nn.Linear default init: U(-1/sqrt(F), 1/sqrt(F)), weight layout (out, in)
    bound = 1.0 / (F ** 0.5)
    w = jax.random.uniform(kw, (model_nums, F), jnp.float32, -bound, bound)
    b = jax.random.uniform(kb, (model_nums,), jnp.float32, -bound, bound)

    # input shaped (B, model_nums, v_dim); forward view(-1, F) flattens it
    x = jax.random.normal(kx, (B, model_nums, v_dim), jnp.float32)

    # softmax path, small block_b=8 to force 2 grid steps (exercises tiling)
    out_sm = jax.block_until_ready(gate_net(x, w, b, softmax=True, block_b=8))
    ref_sm = reference(x, w, b, softmax=True)
    assert out_sm.shape == (B, model_nums)
    assert jnp.allclose(out_sm, ref_sm, atol=5e-3, rtol=5e-3), "softmax mismatch"
    assert jnp.allclose(jnp.sum(out_sm, axis=1), jnp.ones((B,)), atol=1e-2)

    # logits path (sm=0), default tiling
    out_lg = jax.block_until_ready(gate_net(x, w, b, softmax=False))
    ref_lg = reference(x, w, b, softmax=False)
    assert out_lg.shape == (B, model_nums)
    assert jnp.allclose(out_lg, ref_lg, atol=2e-2, rtol=2e-2), "logits mismatch"

    print("KERNEL_OK")
</pallas_src>

<mosaic_0001>
module attributes {stable_mosaic.version = 11 : i64} {
  func.func @_gatenet_softmax_kernel(%arg0: i32, %arg1: memref<8x128xbf16, #tpu.memory_space<vmem>>, %arg2: memref<128x128xbf16, #tpu.memory_space<vmem>>, %arg3: memref<1x128xf32, #tpu.memory_space<vmem>>, %arg4: memref<8x128xf32, #tpu.memory_space<vmem>>) attributes {dimension_semantics = [#tpu.dimension_semantics<parallel>], iteration_bounds = array<i64: 2>, scalar_prefetch = 0 : i64, scratch_operands = 0 : i64, tpu.core_type = #tpu.core_type<tc>, window_params = [{transform_indices = @transform_0, window_bounds = array<i64: 8, 128>}, {pipeline_mode = #tpu.pipeline_mode<synchronous>, transform_indices = @transform_1, window_bounds = array<i64: 128, 128>}, {pipeline_mode = #tpu.pipeline_mode<synchronous>, transform_indices = @transform_2, window_bounds = array<i64: 1, 128>}, {transform_indices = @transform_3, window_bounds = array<i64: 8, 128>}]} {
    %c0 = arith.constant 0 : index
    %c0_0 = arith.constant 0 : index
    %0 = vector.load %arg1[%c0, %c0_0] : memref<8x128xbf16, #tpu.memory_space<vmem>>, vector<8x128xbf16>
    %c0_1 = arith.constant 0 : index
    %c0_2 = arith.constant 0 : index
    %1 = vector.load %arg2[%c0_1, %c0_2] : memref<128x128xbf16, #tpu.memory_space<vmem>>, vector<128x128xbf16>
    %cst = arith.constant dense<0.000000e+00> : vector<8x128xf32>
    %2 = tpu.matmul %0, %1, %cst {dimension_numbers = #tpu.dot_dimension_numbers<[1], [0], [0], [1], [0, 0, 1, 1], [], []>} : vector<8x128xbf16>, vector<128x128xbf16>, vector<8x128xf32> -> vector<8x128xf32>
    %c0_3 = arith.constant 0 : index
    %c0_4 = arith.constant 0 : index
    %3 = vector.load %arg3[%c0_3, %c0_4] : memref<1x128xf32, #tpu.memory_space<vmem>>, vector<1x128xf32>
    %4 = vector.broadcast %3 : vector<1x128xf32> to vector<8x128xf32>
    %5 = arith.addf %2, %4 : vector<8x128xf32>
    %cst_5 = arith.constant dense<0xFF800000> : vector<8xf32>
    %6 = vector.multi_reduction <maximumf>, %5, %cst_5 [1] : vector<8x128xf32> to vector<8xf32>
    %7 = vector.shape_cast %6 : vector<8xf32> to vector<8x1xf32>
    %8 = vector.broadcast %7 : vector<8x1xf32> to vector<8x128xf32>
    %9 = arith.subf %5, %8 : vector<8x128xf32>
    %10 = math.exp %9 : vector<8x128xf32>
    %cst_6 = arith.constant dense<0.000000e+00> : vector<8xf32>
    %11 = vector.multi_reduction <add>, %10, %cst_6 [1] : vector<8x128xf32> to vector<8xf32>
    %12 = vector.shape_cast %11 : vector<8xf32> to vector<8x1xf32>
    %13 = tpu.reciprocal %12 {approx = true} : vector<8x1xf32> -> vector<8x1xf32>
    %14 = vector.broadcast %13 : vector<8x1xf32> to vector<8x128xf32>
    %15 = arith.mulf %10, %14 : vector<8x128xf32>
    %c0_7 = arith.constant 0 : index
    %c0_8 = arith.constant 0 : index
    %16 = vector.load %arg4[%c0_7, %c0_8] : memref<8x128xf32, #tpu.memory_space<vmem>>, vector<8x128xf32>
    tpu.vector_store %arg4[%c0_7, %c0_8], %15 {strides = array<i32>} : memref<8x128xf32, #tpu.memory_space<vmem>>, vector<8x128xf32>,
    return
  }
  func.func @transform_0(%arg0: i32) -> (i32, i32) {
    %c0_i32 = arith.constant 0 : i32
    %c0_i32_0 = arith.constant 0 : i32
    return %arg0, %c0_i32 : i32, i32
  }
  func.func @transform_1(%arg0: i32) -> (i32, i32) {
    %c0_i32 = arith.constant 0 : i32
    %c0_i32_0 = arith.constant 0 : i32
    %c0_i32_1 = arith.constant 0 : i32
    return %c0_i32, %c0_i32_0 : i32, i32
  }
  func.func @transform_2(%arg0: i32) -> (i32, i32) {
    %c0_i32 = arith.constant 0 : i32
    %c0_i32_0 = arith.constant 0 : i32
    %c0_i32_1 = arith.constant 0 : i32
    return %c0_i32, %c0_i32_0 : i32, i32
  }
  func.func @transform_3(%arg0: i32) -> (i32, i32) {
    %c0_i32 = arith.constant 0 : i32
    %c0_i32_0 = arith.constant 0 : i32
    return %arg0, %c0_i32 : i32, i32
  }
}

</mosaic_0001>

<bundles_post_ra>
// kernel: tpu_custom_call.1
= control target key start
LH: loop header
LB: loop body
LE: loop exit
PB: predicated region body
PF: predicated region fallthrough
CT: control target
= control target key end

     0   :  { %8 = vsyncpa [#allocation3], 0  ;;  %s903_s0 = inlined_call_operand.hbm [shape: bf16[16,128], index: 0, kind: input, shape index: {}]   ;;  %s904_s1 = inlined_call_operand.hbm [shape: bf16[128,128], index: 1, kind: input, shape index: {}]   ;;  %s905_s2 = inlined_call_operand.vmem [shape: f32[1,128], index: 2, kind: input, shape index: {}]   ;;  %s906_s3 = inlined_call_operand.hbm [shape: f32[16,128], index: 3, kind: output, shape index: {}]  }
   0x1   :  { %10 = vsyncpa [#allocation3 + $0x1], 0 }
   0x2   :  { %11 = vsyncpa [#allocation6], 0 }
   0x3   :  { %12 = vsyncpa [#allocation4], 0 }
   0x4   :  { %14 = vsyncpa [#allocation4 + $0x1], 0  ;;  %s700_s12 = smov 0   ;;  %s702_s13 = smov 0  }
   0x5   :  { %s704_s14 = smov 0   ;;  %s706_s15 = smov 0  }
   0x6 LB: > { %s721_s16 = sadd.s32 4294967295, %s671_s15   ;;  %s418_s17 = sadd.s32 4294967294, %s671_s15   ;;  %s671_s15 = sphi %s706_s15, %s926_s15   ;;  %s667_s14 = sphi %s704_s14, %s925_s14   ;;  %s663_s13 = sphi %s702_s13, %s924_s13   ;;  %s659_s12 = sphi %s700_s12, %s923_s12  }
   0x7   : > { %p40_p0 = scmp.ne.s32.totalorder %s663_s13, %s659_s12  ;;  %p907_p1 = scmp.eq.s32.totalorder %s721_s16, 0 }
   0x8   : > { %p112_p3 = scmp.eq.s32.totalorder %s418_s17, 1  ;;  %p419_p5 = scmp.ge.s32.totalorder %s671_s15, 1 }
   0x9   : > { %p730_p4 = por %p907_p1, %p40_p0  ;;  %p119_p7 = scmp.lt.s32.totalorder %s671_s15, 3 }
   0xa   : > { %p735_p6 = por %p112_p3, %p40_p0  ;;  %s673_s21 = smov [#allocation5]  }
   0xb   : > { %s910_s18 = scalar_select %p730_p4, 1, 0 }
   0xc   : > { %s911_s19 = scalar_select %p735_p6, 1, 0 }
   0xd   : > { %p740_p8 = pnand %p419_p5, %p119_p7  ;;  %s131_s22 = sshll.u32 %s673_s21, 4  ;;  %s744_s22 = int_to_ptr.vmem [resolvable:$true] %s131_s22 }
   0xe   : > { %s756_s24 = sadd.s32 1, %s671_s15   ;;  %s27_s25 = sadd.s32 1, %s667_s14 }
   0xf   : > { %s912_s20 = scalar_select %p740_p8, 1, 0 }
  0x10   : > { %p478_p9 = pneg %p740_p8  ;;  %s24_s26 = ssub.s32 %s671_s15, %s756_s24 }
  0x11   : > { %s543_s29 = scalar_lea.hbm %s904_s1, 1024 }
  0x12   : > { %p751_p11 = pnand %p478_p9, %p907_p1  ;;  %p544_p12 = scmp.ne.s32.totalorder %s904_s1, %s543_s29 }
  0x13   : > { %p550_p5 = scmp.lt.u32.totalorder %s543_s29, %s904_s1 }
  0x14   : > { %p545_p13 = pneg %p751_p11 }
  0x16   : > { %p546_p0 = pnand %p545_p13, %p544_p12 }
  0x18   : > { %p547_p3 = pneg %p546_p0 }
  0x1a   : > { %p552_p7 = pnand %p550_p5, %p547_p3 }
  0x1c   : > { %555 = shalt.err (!%p552_p7)
}
  0x1d   : > { %s556_s7 = scalar_lea.vmem %s744_s22, 1024  ;;  %p564_p2 = scmp.lt.s32.totalorder %s744_s22, %s744_s22 }
  0x1e   : > { %p557_p9 = scmp.ne.s32.totalorder %s744_s22, %s556_s7  ;;  %p565_p6 = scmp.lt.s32.totalorder %s556_s7, %s556_s7 }
  0x20   : > { %p559_p10 = pnand %p557_p9, %p545_p13  ;;  %p566_p4 = por %p565_p6, %p564_p2 }
  0x22   : > { %p560_p1 = pneg %p559_p10 }
  0x24   : > { %p567_p8 = pnand %p566_p4, %p560_p1 }
  0x26   : > { %570 = shalt.err (!%p567_p8)
}
  0x27   : > { %s674_s8 = smov 64   ;;  %s675_s9 = smov 4  }
  0x28   : > { %481 = dma.hbm_to_vmem [thread:$0]  (!%p751_p11), %s904_s1, 1024, %s744_s22, [#allocation6], %s674_s8, %s674_s8, %s675_s9  }
  0x29   : > { %p25_p2 = scmp.eq.s32.totalorder %s24_s26, 0  ;;  %p34_p1 = scmp.ne.s32.totalorder %s667_s14, %s663_s13 }
  0x2a   : > { %p35_p4 = scmp.eq.s32.totalorder %s671_s15, 0  ;;  %p491_p6 = scmp.lt.s32.totalorder %s671_s15, 2 }
  0x2b   : > { %s787_s17 = scalar_select %p25_p2, %s667_s14, %s27_s25  }
  0x2c   : > { %p36_p8 = por %p35_p4, %p34_p1  ;;  %p914_p10 = scmp.eq.s32.totalorder %s721_s16, 1 }
  0x2d   : > { %s148_s27 = sand.u32 1, %s667_s14   ;;  %s423_s28 = sshll.u32 %s671_s15, 6 }
  0x2e   : > { %p791_p12 = por %p914_p10, %p34_p1  ;;  %s422_s29 = sshll.u32 %s148_s27, 2 }
  0x2f   : > { %s800_s4 = scalar_lea.hbm %s903_s0, %s423_s28  ;;  %s152_s22 = scalar_lea.vmem [#allocation2], %s422_s29 }
  0x30   : > { %s159_s25 = sshll.u32 %s152_s22, 4  ;;  %p802_p11 = pnand %p491_p6, %p36_p8  ;;  %s806_s25 = int_to_ptr.vmem [resolvable:$true] %s159_s25 }
  0x31   : > { %s149_s5 = scalar_lea.sflag [#allocation3], %s148_s27  ;;  %s571_s6 = scalar_lea.hbm %s800_s4, 64 }
  0x32   : > { %p572_p13 = scmp.ne.s32.totalorder %s800_s4, %s571_s6  ;;  %p573_p0 = pneg %p802_p11 }
  0x33   : > { %s576_s9 = scalar_lea.hbm %s903_s0, 128  ;;  %p577_p7 = scmp.lt.u32.totalorder %s800_s4, %s903_s0 }
  0x34   : > { %p574_p3 = pnand %p573_p0, %p572_p13  ;;  %p578_p9 = scmp.lt.u32.totalorder %s576_s9, %s571_s6 }
  0x35   : > { %p580_p1 = scmp.lt.u32.totalorder %s571_s6, %s800_s4 }
  0x36   : > { %p575_p5 = pneg %p574_p3  ;;  %p579_p2 = por %p578_p9, %p577_p7 }
  0x38   : > { %p581_p4 = por %p580_p1, %p579_p2 }
  0x3a   : > { %p582_p6 = pnand %p581_p4, %p575_p5 }
  0x3c   : > { %585 = shalt.err (!%p582_p6)
}
  0x3d   : > { %s586_s27 = scalar_lea.vmem %s806_s25, 64  ;;  %s676_s28 = smov [#allocation2]  }
  0x3e   : > { %p587_p8 = scmp.ne.s32.totalorder %s806_s25, %s586_s27  ;;  %s591_s29 = sshll.u32 %s676_s28, 4  ;;  %s592_s29 = int_to_ptr.vmem [resolvable:$false] %s591_s29 }
  0x3f   : > { %s593_s23 = scalar_lea.vmem %s592_s29, 128  ;;  %p594_p3 = scmp.lt.s32.totalorder %s806_s25, %s592_s29 }
  0x40   : > { %p589_p10 = pnand %p587_p8, %p573_p0  ;;  %p595_p7 = scmp.lt.s32.totalorder %s593_s23, %s586_s27 }
  0x42   : > { %p590_p13 = pneg %p589_p10  ;;  %p596_p9 = por %p595_p7, %p594_p3 }
  0x44   : > { %p597_p2 = pnand %p596_p9, %p590_p13 }
  0x46   : > { %600 = shalt.err (!%p597_p2)
}
  0x47   : > { %485 = dma.hbm_to_vmem [thread:$0]  (!%p802_p11), %s800_s4, 64, %s806_s25, %s149_s5  }
  0x48   : > { %p917_p5 = scmp.ne.s32.totalorder %s912_s20, 0 }
  0x49   : > { %s836_s30 = sand.u32 (!%p917_p5), 1, %s663_s13   ;;  %p918_p0 = scmp.ne.s32.totalorder (!%p917_p5), %s910_s18, 0 }
  0x4a   : > { %168 = sbr.rel (%p917_p5) target bundleno = 658 (0x292), region = 32  ;;  %s425_s22 = sshll.u32 (!%p917_p5), %s836_s30, 2 }
  0x4b   : > { %s171_s6 = scalar_lea.sflag (!%p917_p5), [#allocation3], %s836_s30  ;;  %s840_s7 = scalar_lea.vmem (!%p917_p5), [#allocation2], %s425_s22 }
  0x51   : > { %646 = dma.done.wait (%p918_p0), %s171_s6, 64  }
  0x52   : > { %648 = vsyncadd (%p918_p0), %s171_s6, 4294967232  ;;  %p919_p11 = scmp.eq.s32.totalorder %s721_s16, 0 }
  0x54   : > { %650 = dma.done.wait (%p919_p11), [#allocation6], 1024   ;;  %p920_p1 = pmov %p919_p11 }
  0x55   : > { %v677_v0 = vmov 0.0   ;;  %vm678_vm0 = vmmov 0   ;;  %v531_v1 = vld [vmem:[#allocation5] sm:$0xff]   ;;  %v532_v2 = vld [vmem:[#allocation5 + $0x8] sm:$0xff]   ;;  %v533_v3 = vld [vmem:[#allocation5 + $0x10] sm:$0xff]   ;;  %s427_s4 = sshll.u32 %s836_s30, 3 }
  0x56   : > { %652 = vsyncadd (%p920_p1), [#allocation6], 4294966272  ;;  %450 = vmatprep.subr.bf16.mxu0 %v677_v0  ;;  %466 = vmatprep.mubr.msk.bf16.mxu0 %vm678_vm0, %v677_v0  ;;  %v534_v4 = vld [vmem:[#allocation5 + $0x18] sm:$0xff]   ;;  %v535_v5 = vld [vmem:[#allocation5 + $0x20] sm:$0xff]   ;;  %s438_s25 = sshll.u32 %s721_s16, 7  ;;  %s200_s26 = scalar_lea.vmem [#allocation7], %s427_s4 }
  0x57   : > { %451 = vmatpush3.bf16.msra.mxu0 %v531_v1  ;;  %v536_v6 = vld [vmem:[#allocation5 + $0x28] sm:$0xff]   ;;  %v537_v7 = vld [vmem:[#allocation5 + $0x30] sm:$0xff]   ;;  %v538_v8 = vld [vmem:[#allocation5 + $0x38] sm:$0xff]   ;;  %s338_s5 = sshll.u32 %s200_s26, 4  ;;  %s859_s10 = scalar_lea.hbm %s906_s3, %s438_s25  ;;  %s861_s5 = int_to_ptr.vmem [resolvable:$true] %s338_s5 }
  0x58   : > { %452 = vmatprep.subr.bf16.mxu0 %v677_v0  ;;  %v202_v9 = vld [vmem:[%s840_s7] sm:$0xf]  ;;  %s325_s11 = scalar_lea.sflag [#allocation4], %s836_s30  ;;  %s601_s27 = scalar_lea.vmem %s861_s5, 128 }
  0x59   : > { %v428_v10 = vld [vmem:[%s905_s2] ss:$0 sm:$0xff]  ;;  %p602_p4 = scmp.ne.s32.totalorder %s861_s5, %s601_s27  ;;  %s679_s16 = smov [#allocation7]  }
  0x5a   : > { %s605_s28 = sshll.u32 %s679_s16, 4  ;;  %s606_s28 = int_to_ptr.vmem [resolvable:$false] %s605_s28 }
  0x5b   : > { %453 = vmatpush3.bf16.msra.mxu0 %v532_v2  ;;  %p603_p6 = pnand %p602_p4, %p791_p12  ;;  %s607_s29 = scalar_lea.vmem %s606_s28, 256 }
  0x5c   : > { %454 = vmatprep.subr.bf16.mxu0 %v677_v0  ;;  %p608_p10 = scmp.lt.s32.totalorder %s861_s5, %s606_s28  ;;  %p609_p13 = scmp.lt.s32.totalorder %s607_s29, %s601_s27 }
  0x5d   : > { %p604_p8 = pneg %p603_p6 }
  0x5e   : > { %p610_p3 = por %p609_p13, %p608_p10 }
  0x5f   : > { %455 = vmatpush3.bf16.msra.mxu0 %v533_v3 }
  0x60   : > { %456 = vmatprep.subr.bf16.mxu0 %v677_v0  ;;  %p611_p7 = pnand %p610_p3, %p604_p8 }
  0x63   : > { %457 = vmatpush3.bf16.msra.mxu0 %v534_v4 }
  0x64   : > { %458 = vmatprep.subr.bf16.mxu0 %v677_v0 }
  0x67   : > { %459 = vmatpush3.bf16.msra.mxu0 %v535_v5 }
  0x68   : > { %460 = vmatprep.subr.bf16.mxu0 %v677_v0 }
  0x6b   : > { %461 = vmatpush3.bf16.msra.mxu0 %v536_v6 }
  0x6c   : > { %462 = vmatprep.subr.bf16.mxu0 %v677_v0 }
  0x6f   : > { %463 = vmatpush3.bf16.msra.mxu0 %v537_v7 }
  0x70   : > { %464 = vmatprep.subr.bf16.mxu0 %v677_v0 }
  0x73   : > { %465 = vmatpush3.bf16.msra.mxu0 %v538_v8 }
  0x76   : > { %467 = vmatmul.mubr.bf16.vlgmr.msra.gmra.mrb[0].mxu0 %v202_v9 }
 0x149   : > { %v308_v11 = vpop.f32.mrb[0].mxu0 }
 0x14a   : > { %v309_v12 = vadd.f32 %v428_v10, %v308_v11  ;;  %v468_v13 = vpop.f32.mrb[1].mxu0 }
 0x14b   : > { %v311_v14 = vpop.f32.mrb[2].mxu0 }
 0x14c   : > { %314 = vmax.xlane.f32.xlu0 %v309_v12  ;;  %v469_v15 = vpop.f32.mrb[3].mxu0 }
 0x1d9   : > { %v315_v16 = vpop.xlane.xlu0 %314 }
 0x1da   : > { %v316_v17 = vsub.f32 %v309_v12, %v315_v16 }
 0x1dc   : > { %v317_v18 = vmul.f32 1.442695, %v316_v17 }
 0x1de   : > { %539 = vpow2.f32 %v317_v18 }
 0x1e8   : > { %v540_v19 = vpop.eup %539 }
 0x1e9   : > { %319 = vadd.xlane.f32.xlu0 %v540_v19 }
 0x276   : > { %v320_v20 = vpop.xlane.xlu0 %319 }
 0x277   : > { %541 = vrcp.f32 %v320_v20 }
 0x281   : > { %v542_v21 = vpop.eup %541 }
 0x282   : > { %v322_v22 = vmul.f32 %v542_v21, %v540_v19 }
 0x284   : > { %323 = vst [vmem:[%s200_s26] sm:$0xff] %v322_v22 }
 0x285   : > { %614 = shalt.err (!%p611_p7)
}
 0x286   : > { %s615_s23 = scalar_lea.hbm %s859_s10, 128  ;;  %s619_s6 = scalar_lea.hbm %s906_s3, 256 }
 0x287   : > { %p616_p9 = scmp.ne.s32.totalorder %s859_s10, %s615_s23  ;;  %p620_p0 = scmp.lt.u32.totalorder %s859_s10, %s906_s3 }
 0x288   : > { %p621_p11 = scmp.lt.u32.totalorder %s619_s6, %s615_s23  ;;  %p623_p4 = scmp.lt.u32.totalorder %s615_s23, %s859_s10 }
 0x289   : > { %p617_p2 = pnand %p616_p9, %p791_p12 }
 0x28a   : > { %p622_p1 = por %p621_p11, %p620_p0 }
 0x28b   : > { %p618_p5 = pneg %p617_p2 }
 0x28c   : > { %p624_p6 = por %p623_p4, %p622_p1 }
 0x28e   : > { %p625_p8 = pnand %p624_p6, %p618_p5 }
 0x290   : > { %628 = shalt.err (!%p625_p8)
}
 0x291   : > { %476 = dma.vmem_to_hbm [thread:$0]  (%p791_p12), %s861_s5, 128, %s859_s10, %s325_s11  }
 0x292 PF: > { %s350_s20 = sand.u32 1, %s659_s12   ;;  %p921_p10 = scmp.ne.s32.totalorder %s911_s19, 0 }
 0x293   : > { %p922_p13 = scmp.ge.s32.totalorder %s671_s15, 2  ;;  %s351_s4 = scalar_lea.sflag [#allocation4], %s350_s20 }
 0x295   : > { %p487_p3 = pnand %p922_p13, %p921_p10 }
 0x297   : > { %654 = dma.done.wait (!%p487_p3), %s351_s4, 128  }
 0x298   : > { %656 = vsyncadd (!%p487_p3), %s351_s4, 4294967168  ;;  %p17_p7 = scmp.ge.s32.totalorder %s756_s24, 4   ;;  %s923_s12 = smov %s663_s13 }
 0x299   : > { %s924_s13 = smov %s667_s14  ;;  %s925_s14 = smov %s787_s17 }
 0x29a   : > { %s926_s15 = smov %s756_s24  ;;  %19 = sbr.rel (!%p17_p7) target bundleno = 6 (0x6), region = 81 }
 0x2a1   :  { %356 = vsyncpa [#allocation3], 1 }
 0x2a2   :  { %358 = vsyncpa [#allocation3 + $0x1], 1 }
 0x2a3   :  { %359 = vsyncpa [#allocation6], 1 }
 0x2a4   :  { %360 = vsyncpa [#allocation4], 1 }
 0x2a5   :  { %362 = vsyncpa [#allocation4 + $0x1], 1 }

</bundles_post_ra>
